<compile_context>
chip_gen: v5e
topology: v5e:2x2
jax: 0.10.0
libtpu: 0.0.40
codegen_flags: <defaults>
</compile_context>

<pallas_src>
import functools
import math

import jax
import jax.numpy as jnp
import numpy as np
from jax import lax
from jax.experimental import pallas as pl
from jax.experimental.pallas import tpu as pltpu

_F32_BYTES = 4
_BQ_CANDIDATES = (1024, 512, 256, 128, 64, 32, 16, 8)


# --------------------------------------------------------------------------- #
# VMEM budgeting helpers
# --------------------------------------------------------------------------- #
def _round_up(x, m):
    return ((x + m - 1) // m) * m


def _vmem_capacity_bytes():
    try:
        cap = int(pltpu.get_tpu_info().vmem_capacity_bytes)
        if cap > 0:
            return cap
    except Exception:
        pass
    return 64 * 1024 * 1024  # conservative: v7x per-TensorCore VMEM


def _full_footprint(bq, sk, dk, in_b, out_b):
    """Per-grid-step VMEM bytes for the full-attn path."""
    tmp = 3 * bq * sk * _F32_BYTES          # scores / exp / probs (f32)
    attn_out = 2 * bq * sk * out_b          # double-buffered attn tile
    o_out = 2 * bq * dk * out_b             # double-buffered out tile
    q_in = 2 * bq * dk * in_b               # double-buffered q tile
    kv_in = 2 * 2 * sk * dk * in_b          # double-buffered K and V
    return tmp + attn_out + o_out + q_in + kv_in


def _flash_footprint(bq, bk, dk, in_b, out_b):
    """Per-grid-step VMEM bytes for the flash (KV-tiled) path."""
    tmp = 3 * bq * bk * _F32_BYTES
    q_in = 2 * bq * dk * in_b
    kv_in = 2 * 2 * bk * dk * in_b
    o_out = 2 * bq * dk * out_b
    scr = bq * dk * _F32_BYTES + 2 * bq * _F32_BYTES
    return tmp + q_in + kv_in + o_out + scr


# --------------------------------------------------------------------------- #
# Kernels
# --------------------------------------------------------------------------- #
def _sdpa_full_kernel(scale, scale_q, q_ref, k_ref, v_ref, o_ref, attn_ref):
    """One grid step = one (batch, head, q-tile); full Sk resident."""
    q = q_ref[0, 0]      # (bq, dk)
    k = k_ref[0, 0]      # (sk, dk)
    v = v_ref[0, 0]      # (sk, dk)

    if scale_q:          # f32 inputs: scale Q (bq*dk mults, exact)
        q = q * jnp.asarray(scale, dtype=q.dtype)

    # scores = Q @ K^T -- contract last dims, no transpose op, f32 accumulate.
    scores = lax.dot_general(q, k, (((1,), (1,)), ((), ())),
                             preferred_element_type=jnp.float32)   # (bq, sk)
    if not scale_q:      # low-precision inputs: scale the f32 scores (exact)
        scores = scores * jnp.float32(scale)

    # Numerically-stable softmax; reciprocal lowers to the otherwise-idle EUP.
    m = jnp.max(scores, axis=-1, keepdims=True)
    e = jnp.exp(scores - m)
    denom = jnp.sum(e, axis=-1, keepdims=True)
    p = e * pl.reciprocal(denom, approx=True)                      # (bq, sk) f32

    # Single cast of the largest tile; reuse it for the matmul when dtypes match.
    p_store = p.astype(attn_ref.dtype)
    attn_ref[0, 0] = p_store
    p_mm = p_store if attn_ref.dtype == v.dtype else p.astype(v.dtype)

    out = jnp.dot(p_mm, v, preferred_element_type=jnp.float32)
    o_ref[0, 0] = out.astype(o_ref.dtype)


def _sdpa_flash_kernel(scale, scale_q, bk, sk_real, needs_mask,
                       q_ref, k_ref, v_ref, o_ref, m_sc, l_sc, acc_sc):
    """Flash-style online softmax; one grid step = one (b, h, q-tile, kv-tile)."""
    kv = pl.program_id(3)

    @pl.when(kv == 0)
    def _():
        m_sc[...] = jnp.full_like(m_sc, -jnp.inf)
        l_sc[...] = jnp.zeros_like(l_sc)
        acc_sc[...] = jnp.zeros_like(acc_sc)

    q = q_ref[0, 0]      # (bq, dk)
    k = k_ref[0, 0]      # (bk, dk)
    v = v_ref[0, 0]      # (bk, dk)

    if scale_q:
        q = q * jnp.asarray(scale, dtype=q.dtype)
    s = lax.dot_general(q, k, (((1,), (1,)), ((), ())),
                        preferred_element_type=jnp.float32)        # (bq, bk)
    if not scale_q:
        s = s * jnp.float32(scale)

    if needs_mask:  # Sk padded up to a multiple of bk -> mask the padded keys.
        col = kv * bk + lax.broadcasted_iota(jnp.int32, s.shape, 1)
        s = jnp.where(col < sk_real, s, jnp.float32(-1e30))

    m_new = jnp.maximum(m_sc[...], jnp.max(s, axis=-1, keepdims=True))
    alpha = jnp.exp(m_sc[...] - m_new)
    p = jnp.exp(s - m_new)
    l_sc[...] = alpha * l_sc[...] + jnp.sum(p, axis=-1, keepdims=True)
    acc_sc[...] = alpha * acc_sc[...] + jnp.dot(
        p.astype(v.dtype), v, preferred_element_type=jnp.float32)
    m_sc[...] = m_new

    @pl.when(kv == pl.num_programs(3) - 1)
    def _():
        o_ref[0, 0] = (acc_sc[...] *
                       pl.reciprocal(l_sc[...], approx=True)).astype(o_ref.dtype)


# --------------------------------------------------------------------------- #
# Wrappers
# --------------------------------------------------------------------------- #
def _run_full(q, k, v, scale, scale_q, budget, cap):
    B, H, Sq, Dk = q.shape
    Sk = k.shape[2]
    in_b = jnp.dtype(q.dtype).itemsize
    out_b = in_b

    # VMEM-aware query tile.
    sq_cap = max(8, _round_up(Sq, 8))
    bq = None
    for cand in _BQ_CANDIDATES:
        if cand > sq_cap:
            continue
        if _full_footprint(cand, Sk, Dk, in_b, out_b) <= budget:
            bq = cand
            break
    if bq is None:
        bq = 8  # smallest legal tile; attn row must be materialised regardless

    Sq_p = _round_up(Sq, bq)
    q_p = q if Sq_p == Sq else jnp.pad(q, ((0, 0), (0, 0), (0, Sq_p - Sq), (0, 0)))

    grid = (B, H, Sq_p // bq)

    q_spec = pl.BlockSpec((1, 1, bq, Dk), lambda b, h, i: (b, h, i, 0))
    kv_spec = pl.BlockSpec((1, 1, Sk, Dk), lambda b, h, i: (b, h, 0, 0))
    o_spec = pl.BlockSpec((1, 1, bq, Dk), lambda b, h, i: (b, h, i, 0))
    a_spec = pl.BlockSpec((1, 1, bq, Sk), lambda b, h, i: (b, h, i, 0))

    need = _full_footprint(bq, Sk, Dk, in_b, out_b)
    vmem_limit = int(min(cap * 0.9, max(need * 1.5, 32 * 1024 * 1024)))

    flops = 4 * B * H * Sq * Sk * Dk
    bytes_accessed = ((2 * B * H * Sq * Dk + 2 * B * H * Sk * Dk) * in_b
                      + B * H * Sq * Sk * out_b)
    cost = pl.CostEstimate(flops=flops, transcendentals=B * H * Sq * Sk,
                           bytes_accessed=bytes_accessed)

    kernel = functools.partial(_sdpa_full_kernel, scale, scale_q)

    out, attn = pl.pallas_call(
        kernel,
        out_shape=(jax.ShapeDtypeStruct((B, H, Sq_p, Dk), q.dtype),
                   jax.ShapeDtypeStruct((B, H, Sq_p, Sk), q.dtype)),
        grid_spec=pltpu.PrefetchScalarGridSpec(
            num_scalar_prefetch=0,
            grid=grid,
            in_specs=[q_spec, kv_spec, kv_spec],
            out_specs=(o_spec, a_spec),
        ),
        compiler_params=pltpu.CompilerParams(
            dimension_semantics=("parallel", "parallel", "arbitrary"),
            vmem_limit_bytes=vmem_limit),
        cost_estimate=cost,
    )(q_p, k, v)

    if Sq_p != Sq:
        out = out[:, :, :Sq, :]
        attn = attn[:, :, :Sq, :]
    return out, attn


def _run_flash(q, k, v, scale, scale_q, budget, cap):
    B, H, Sq, Dk = q.shape
    Sk = k.shape[2]
    in_b = jnp.dtype(q.dtype).itemsize
    out_b = in_b

    sq_cap = max(8, _round_up(Sq, 8))
    sk_cap = max(8, _round_up(Sk, 8))

    bq = next((c for c in _BQ_CANDIDATES if c <= sq_cap), 8)
    while bq > 8 and _flash_footprint(bq, 8, Dk, in_b, out_b) > budget:
        bq //= 2
    bk = 8
    for cand in _BQ_CANDIDATES:
        if cand > sk_cap:
            continue
        if _flash_footprint(bq, cand, Dk, in_b, out_b) <= budget:
            bk = cand
            break

    Sq_p = _round_up(Sq, bq)
    Sk_p = _round_up(Sk, bk)
    needs_mask = (Sk_p != Sk)

    q_p = q if Sq_p == Sq else jnp.pad(q, ((0, 0), (0, 0), (0, Sq_p - Sq), (0, 0)))
    k_p = k if Sk_p == Sk else jnp.pad(k, ((0, 0), (0, 0), (0, Sk_p - Sk), (0, 0)))
    v_p = v if Sk_p == Sk else jnp.pad(v, ((0, 0), (0, 0), (0, Sk_p - Sk), (0, 0)))

    grid = (B, H, Sq_p // bq, Sk_p // bk)

    q_spec = pl.BlockSpec((1, 1, bq, Dk), lambda b, h, i, j: (b, h, i, 0))
    k_spec = pl.BlockSpec((1, 1, bk, Dk), lambda b, h, i, j: (b, h, j, 0))
    v_spec = pl.BlockSpec((1, 1, bk, Dk), lambda b, h, i, j: (b, h, j, 0))
    o_spec = pl.BlockSpec((1, 1, bq, Dk), lambda b, h, i, j: (b, h, i, 0))

    need = _flash_footprint(bq, bk, Dk, in_b, out_b)
    vmem_limit = int(min(cap * 0.9, max(need * 1.5, 32 * 1024 * 1024)))

    flops = 4 * B * H * Sq * Sk * Dk
    bytes_accessed = (2 * B * H * Sq * Dk + 2 * B * H * Sk * Dk) * in_b
    cost = pl.CostEstimate(flops=flops, transcendentals=2 * B * H * Sq * Sk,
                           bytes_accessed=bytes_accessed)

    kernel = functools.partial(_sdpa_flash_kernel, scale, scale_q, bk, Sk, needs_mask)

    out = pl.pallas_call(
        kernel,
        out_shape=jax.ShapeDtypeStruct((B, H, Sq_p, Dk), q.dtype),
        grid_spec=pltpu.PrefetchScalarGridSpec(
            num_scalar_prefetch=0,
            grid=grid,
            in_specs=[q_spec, k_spec, v_spec],
            out_specs=o_spec,
            scratch_shapes=[pltpu.VMEM((bq, 1), jnp.float32),
                            pltpu.VMEM((bq, 1), jnp.float32),
                            pltpu.VMEM((bq, Dk), jnp.float32)]),
        compiler_params=pltpu.CompilerParams(
            dimension_semantics=("parallel", "parallel", "arbitrary", "arbitrary"),
            vmem_limit_bytes=vmem_limit),
        cost_estimate=cost,
    )(q_p, k_p, v_p)

    if Sq_p != Sq:
        out = out[:, :, :Sq, :]
    return out


def scaled_dot_product_attention(q, k, v, d_k=None, mask=None, *, return_attn=True):
    """Q, K, V: (B, H, S, d_k).

    return_attn=True  -> (output, attn)   [matches the PyTorch module]
    return_attn=False -> output only      [flash path: never materialises attn]
    """
    # TODO(synk): mask != None path (masked_fill) not implemented; module used with mask=None.
    assert mask is None, "mask is not supported by this kernel"

    B, H, Sq, Dk = q.shape
    if d_k is None:
        d_k = Dk
    scale = 1.0 / math.sqrt(d_k)
    scale_q = (q.dtype == jnp.float32)   # low-precision inputs scale f32 scores instead

    cap = _vmem_capacity_bytes()
    budget = int(cap * 0.7)

    if return_attn:
        return _run_full(q, k, v, scale, scale_q, budget, cap)
    return _run_flash(q, k, v, scale, scale_q, budget, cap)


# --------------------------------------------------------------------------- #
# Pure-JAX reference
# --------------------------------------------------------------------------- #
def sdpa_ref(q, k, v, d_k):
    scores = jnp.einsum('bhqd,bhkd->bhqk', q, k) / math.sqrt(d_k)
    attn = jax.nn.softmax(scores, axis=-1)
    out = jnp.einsum('bhqk,bhkd->bhqd', attn, v)
    return out, attn


# --------------------------------------------------------------------------- #
# Main
# --------------------------------------------------------------------------- #
if __name__ == "__main__":
    B, H, S, D_K = 2, 4, 8, 32

    key = jax.random.PRNGKey(0)
    kq, kk, kv = jax.random.split(key, 3)
    Q = jax.random.normal(kq, (B, H, S, D_K), dtype=jnp.float32)
    K = jax.random.normal(kk, (B, H, S, D_K), dtype=jnp.float32)
    V = jax.random.normal(kv, (B, H, S, D_K), dtype=jnp.float32)

    out_ref, attn_ref = sdpa_ref(Q, K, V, D_K)

    # Full path (matches the module: returns (out, attn)).
    out, attn = scaled_dot_product_attention(Q, K, V, d_k=D_K)
    out, attn = jax.block_until_ready((out, attn))
    np.testing.assert_allclose(np.asarray(attn), np.asarray(attn_ref),
                               atol=2e-3, rtol=2e-3)
    np.testing.assert_allclose(np.asarray(out), np.asarray(out_ref),
                               atol=2e-3, rtol=2e-3)

    # Flash path (out only, KV-tiled; useful when attn is not needed).
    out_f = scaled_dot_product_attention(Q, K, V, d_k=D_K, return_attn=False)
    out_f = jax.block_until_ready(out_f)
    np.testing.assert_allclose(np.asarray(out_f), np.asarray(out_ref),
                               atol=2e-3, rtol=2e-3)

    # Ragged sequence length (exercises padding + kv masking).
    B2, H2, S2 = 1, 2, 12
    kq2, kk2, kv2 = jax.random.split(jax.random.PRNGKey(1), 3)
    Q2 = jax.random.normal(kq2, (B2, H2, S2, D_K), dtype=jnp.float32)
    K2 = jax.random.normal(kk2, (B2, H2, S2, D_K), dtype=jnp.float32)
    V2 = jax.random.normal(kv2, (B2, H2, S2, D_K), dtype=jnp.float32)
    out2_ref, attn2_ref = sdpa_ref(Q2, K2, V2, D_K)

    out2, attn2 = scaled_dot_product_attention(Q2, K2, V2, d_k=D_K)
    out2, attn2 = jax.block_until_ready((out2, attn2))
    np.testing.assert_allclose(np.asarray(attn2), np.asarray(attn2_ref),
                               atol=2e-3, rtol=2e-3)
    np.testing.assert_allclose(np.asarray(out2), np.asarray(out2_ref),
                               atol=2e-3, rtol=2e-3)

    out2_f = scaled_dot_product_attention(Q2, K2, V2, d_k=D_K, return_attn=False)
    out2_f = jax.block_until_ready(out2_f)
    np.testing.assert_allclose(np.asarray(out2_f), np.asarray(out2_ref),
                               atol=2e-3, rtol=2e-3)

    print("KERNEL_OK")
</pallas_src>

<mosaic_0001>
module attributes {stable_mosaic.version = 11 : i64} {
  func.func @_sdpa_full_kernel(%arg0: i32, %arg1: i32, %arg2: i32, %arg3: memref<1x1x8x32xf32, #tpu.memory_space<vmem>>, %arg4: memref<1x1x8x32xf32, #tpu.memory_space<vmem>>, %arg5: memref<1x1x8x32xf32, #tpu.memory_space<vmem>>, %arg6: memref<1x1x8x32xf32, #tpu.memory_space<vmem>>, %arg7: memref<1x1x8x8xf32, #tpu.memory_space<vmem>>) attributes {dimension_semantics = [#tpu.dimension_semantics<parallel>, #tpu.dimension_semantics<parallel>, #tpu.dimension_semantics<arbitrary>], iteration_bounds = array<i64: 2, 4, 1>, scalar_prefetch = 0 : i64, scratch_operands = 0 : i64, tpu.core_type = #tpu.core_type<tc>, window_params = [{transform_indices = @transform_0, window_bounds = array<i64: 1, 1, 8, 32>}, {transform_indices = @transform_1, window_bounds = array<i64: 1, 1, 8, 32>}, {transform_indices = @transform_2, window_bounds = array<i64: 1, 1, 8, 32>}, {transform_indices = @transform_3, window_bounds = array<i64: 1, 1, 8, 32>}, {transform_indices = @transform_4, window_bounds = array<i64: 1, 1, 8, 8>}]} {
    %c0 = arith.constant 0 : index
    %c0_0 = arith.constant 0 : index
    %c0_1 = arith.constant 0 : index
    %c0_2 = arith.constant 0 : index
    %0 = vector.load %arg3[%c0, %c0_0, %c0_1, %c0_2] : memref<1x1x8x32xf32, #tpu.memory_space<vmem>>, vector<1x1x8x32xf32>
    %1 = vector.shape_cast %0 : vector<1x1x8x32xf32> to vector<8x32xf32>
    %c0_3 = arith.constant 0 : index
    %c0_4 = arith.constant 0 : index
    %c0_5 = arith.constant 0 : index
    %c0_6 = arith.constant 0 : index
    %2 = vector.load %arg4[%c0_3, %c0_4, %c0_5, %c0_6] : memref<1x1x8x32xf32, #tpu.memory_space<vmem>>, vector<1x1x8x32xf32>
    %3 = vector.shape_cast %2 : vector<1x1x8x32xf32> to vector<8x32xf32>
    %c0_7 = arith.constant 0 : index
    %c0_8 = arith.constant 0 : index
    %c0_9 = arith.constant 0 : index
    %c0_10 = arith.constant 0 : index
    %4 = vector.load %arg5[%c0_7, %c0_8, %c0_9, %c0_10] : memref<1x1x8x32xf32, #tpu.memory_space<vmem>>, vector<1x1x8x32xf32>
    %5 = vector.shape_cast %4 : vector<1x1x8x32xf32> to vector<8x32xf32>
    %cst = arith.constant 0.176776692 : f32
    %6 = vector.broadcast %cst : f32 to vector<8x32xf32>
    %7 = arith.mulf %1, %6 : vector<8x32xf32>
    %cst_11 = arith.constant dense<0.000000e+00> : vector<8x8xf32>
    %8 = tpu.matmul %7, %3, %cst_11 {dimension_numbers = #tpu.dot_dimension_numbers<[1], [1], [0], [0], [0, 0, 1, 0], [], []>} : vector<8x32xf32>, vector<8x32xf32>, vector<8x8xf32> -> vector<8x8xf32>
    %cst_12 = arith.constant dense<0xFF800000> : vector<8xf32>
    %9 = vector.multi_reduction <maximumf>, %8, %cst_12 [1] : vector<8x8xf32> to vector<8xf32>
    %10 = vector.shape_cast %9 : vector<8xf32> to vector<8x1xf32>
    %11 = vector.broadcast %10 : vector<8x1xf32> to vector<8x8xf32>
    %12 = arith.subf %8, %11 : vector<8x8xf32>
    %13 = math.exp %12 : vector<8x8xf32>
    %cst_13 = arith.constant dense<0.000000e+00> : vector<8xf32>
    %14 = vector.multi_reduction <add>, %13, %cst_13 [1] : vector<8x8xf32> to vector<8xf32>
    %15 = vector.shape_cast %14 : vector<8xf32> to vector<8x1xf32>
    %16 = tpu.reciprocal %15 {approx = true} : vector<8x1xf32> -> vector<8x1xf32>
    %17 = vector.broadcast %16 : vector<8x1xf32> to vector<8x8xf32>
    %18 = arith.mulf %13, %17 : vector<8x8xf32>
    %c0_14 = arith.constant 0 : index
    %c0_15 = arith.constant 0 : index
    %c0_16 = arith.constant 0 : index
    %c0_17 = arith.constant 0 : index
    %19 = vector.load %arg7[%c0_14, %c0_15, %c0_16, %c0_17] : memref<1x1x8x8xf32, #tpu.memory_space<vmem>>, vector<1x1x8x8xf32>
    %20 = vector.shape_cast %19 : vector<1x1x8x8xf32> to vector<8x8xf32>
    %21 = vector.shape_cast %18 : vector<8x8xf32> to vector<1x1x8x8xf32>
    tpu.vector_store %arg7[%c0_14, %c0_15, %c0_16, %c0_17], %21 {strides = array<i32>} : memref<1x1x8x8xf32, #tpu.memory_space<vmem>>, vector<1x1x8x8xf32>,
    %cst_18 = arith.constant dense<0.000000e+00> : vector<8x32xf32>
    %22 = tpu.matmul %18, %5, %cst_18 {dimension_numbers = #tpu.dot_dimension_numbers<[1], [0], [0], [1], [0, 0, 1, 1], [], []>} : vector<8x8xf32>, vector<8x32xf32>, vector<8x32xf32> -> vector<8x32xf32>
    %c0_19 = arith.constant 0 : index
    %c0_20 = arith.constant 0 : index
    %c0_21 = arith.constant 0 : index
    %c0_22 = arith.constant 0 : index
    %23 = vector.load %arg6[%c0_19, %c0_20, %c0_21, %c0_22] : memref<1x1x8x32xf32, #tpu.memory_space<vmem>>, vector<1x1x8x32xf32>
    %24 = vector.shape_cast %23 : vector<1x1x8x32xf32> to vector<8x32xf32>
    %25 = vector.shape_cast %22 : vector<8x32xf32> to vector<1x1x8x32xf32>
    tpu.vector_store %arg6[%c0_19, %c0_20, %c0_21, %c0_22], %25 {strides = array<i32>} : memref<1x1x8x32xf32, #tpu.memory_space<vmem>>, vector<1x1x8x32xf32>,
    return
  }
  func.func @transform_0(%arg0: i32, %arg1: i32, %arg2: i32) -> (i32, i32, i32, i32) {
    %c0_i32 = arith.constant 0 : i32
    %c0_i32_0 = arith.constant 0 : i32
    return %arg0, %arg1, %arg2, %c0_i32 : i32, i32, i32, i32
  }
  func.func @transform_1(%arg0: i32, %arg1: i32, %arg2: i32) -> (i32, i32, i32, i32) {
    %c0_i32 = arith.constant 0 : i32
    %c0_i32_0 = arith.constant 0 : i32
    %c0_i32_1 = arith.constant 0 : i32
    return %arg0, %arg1, %c0_i32, %c0_i32_0 : i32, i32, i32, i32
  }
  func.func @transform_2(%arg0: i32, %arg1: i32, %arg2: i32) -> (i32, i32, i32, i32) {
    %c0_i32 = arith.constant 0 : i32
    %c0_i32_0 = arith.constant 0 : i32
    %c0_i32_1 = arith.constant 0 : i32
    return %arg0, %arg1, %c0_i32, %c0_i32_0 : i32, i32, i32, i32
  }
  func.func @transform_3(%arg0: i32, %arg1: i32, %arg2: i32) -> (i32, i32, i32, i32) {
    %c0_i32 = arith.constant 0 : i32
    %c0_i32_0 = arith.constant 0 : i32
    return %arg0, %arg1, %arg2, %c0_i32 : i32, i32, i32, i32
  }
  func.func @transform_4(%arg0: i32, %arg1: i32, %arg2: i32) -> (i32, i32, i32, i32) {
    %c0_i32 = arith.constant 0 : i32
    %c0_i32_0 = arith.constant 0 : i32
    return %arg0, %arg1, %arg2, %c0_i32 : i32, i32, i32, i32
  }
}

</mosaic_0001>

<bundles_post_ra>
// kernel: tpu_custom_call.1
= control target key start
LH: loop header
LB: loop body
LE: loop exit
PB: predicated region body
PF: predicated region fallthrough
CT: control target
= control target key end

     0   :  { %s1205_s0 = inlined_call_operand.hbm [shape: f32[2,4,8,32], index: 0, kind: input, shape index: {}]   ;;  %s1206_s1 = inlined_call_operand.hbm [shape: f32[2,4,8,32], index: 1, kind: input, shape index: {}]   ;;  %s1207_s2 = inlined_call_operand.hbm [shape: f32[2,4,8,32], index: 2, kind: input, shape index: {}]   ;;  %s1208_s3 = inlined_call_operand.hbm [shape: f32[2,4,8,32], index: 3, kind: output, shape index: {0}]   ;;  %s1209_s4 = inlined_call_operand.hbm [shape: f32[2,4,8,8], index: 4, kind: output, shape index: {1}]  }
   0x1   :  { %1216 = sst [smem:[#allocation22_spill]] %s1206_s1 }
   0x2   :  { %10 = vsyncpa [#allocation3], 0 }
   0x3   :  { %12 = vsyncpa [#allocation3 + $0x1], 0 }
   0x4   :  { %13 = vsyncpa [#allocation6], 0 }
   0x5   :  { %15 = vsyncpa [#allocation6 + $0x1], 0 }
   0x6   :  { %16 = vsyncpa [#allocation4], 0 }
   0x7   :  { %18 = vsyncpa [#allocation4 + $0x1], 0 }
   0x8   :  { %19 = vsyncpa [#allocation10], 0 }
   0x9   :  { %21 = vsyncpa [#allocation10 + $0x1], 0  ;;  %s1003_s15 = smov 0   ;;  %s1005_s16 = smov 0  }
   0xa   :  { %s1007_s17 = smov 0   ;;  %s1009_s18 = smov 0  }
   0xb   :  { %s1011_s19 = smov 0   ;;  %s1013_s20 = smov 0  }
   0xc   :  { %s1015_s21 = smov 0   ;;  %s1017_s22 = smov 0  }
   0xd LB: > { %1217 = sst [smem:[#allocation15_spill]] %s956_s17  ;;  %s1044_s23 = sadd.s32 4294967295, %s976_s22   ;;  %s976_s22 = sphi %s1017_s22, %s27_s22   ;;  %s972_s21 = sphi %s1015_s21, %s1237_s21   ;;  %s968_s20 = sphi %s1013_s20, %s1236_s20   ;;  %s964_s19 = sphi %s1011_s19, %s1235_s19   ;;  %s960_s18 = sphi %s1009_s18, %s1234_s18   ;;  %s956_s17 = sphi %s1007_s17, %s1233_s17   ;;  %s952_s16 = sphi %s1005_s16, %s1239_s16   ;;  %s948_s15 = sphi %s1003_s15, %s1238_s15  }
   0xe   : > { %1218 = sst [smem:[#allocation16_spill]] %s968_s20  ;;  %s626_s24 = sadd.s32 4294967294, %s976_s22  }
   0xf   : > { %1219 = sst [smem:[#allocation17_spill]] %s972_s21  ;;  %s42_s25 = sadd.s32 1, %s968_s20 }
  0x10   : > { %s46_s26 = sadd.s32 1, %s972_s21  ;;  %p44_p0 = scmp.ge.s32.totalorder %s42_s25, 4 }
  0x11   : > { %s57_s27 = sadd.s32 1, %s956_s17  ;;  %p64_p1 = scmp.ne.s32.totalorder %s956_s17, %s952_s16 }
  0x12   : > { %p65_p2 = scmp.eq.s32.totalorder %s976_s22, 0  ;;  %s1241_s25 = smov (%p44_p0, %s42_s25), 0 }
  0x13   : > { %1220 = sst [smem:[#allocation18_spill]] %s1241_s25  ;;  %s1243_s26 = smov (!%p44_p0, %s46_s26), %s972_s21 }
  0x14   : > { %s51_s28 = ssub.s32 %s968_s20, %s1241_s25  ;;  %p1058_p3 = por %p65_p2, %p64_p1 }
  0x15   : > { %p48_p4 = scmp.ge.s32.totalorder %s1243_s26, 2  ;;  %p70_p5 = scmp.ne.s32.totalorder %s952_s16, %s948_s15 }
  0x16   : > { %p71_p6 = scmp.eq.s32.totalorder %s1044_s23, 0  ;;  %p154_p7 = scmp.eq.s32.totalorder %s1044_s23, 7 }
  0x17   : > { %s1245_s26 = smov (%p48_p4, %s1243_s26), 0  ;;  %p160_p10 = scmp.eq.s32.totalorder %s626_s24, 7 }
  0x18   : > { %1222 = sst [smem:[#allocation19_spill]] %s1245_s26  ;;  %p1068_p8 = por %p71_p6, %p70_p5 }
  0x19   : > { %p1072_p9 = por %p154_p7, %p64_p1  ;;  %s50_s6 = ssub.s32 %s972_s21, %s1245_s26 }
  0x1a   : > { %s52_s7 = sor.u32 %s51_s28, %s50_s6  ;;  %p1078_p12 = por %p160_p10, %p70_p5 }
  0x1b   : > { %p55_p11 = scmp.eq.s32.totalorder %s52_s7, 0  ;;  %p682_p13 = scmp.lt.s32.totalorder %s976_s22, 8 }
  0x1c   : > { %s1225_s8 = scalar_select %p1078_p12, 1, 0 }
  0x1d   : > { %s210_s9 = sand.u32 1, %s956_s17   ;;  %s630_s12 = sshll.u32 %s972_s21, 2 }
  0x1e   : > { %1226 = sst [smem:[#allocation20_spill]] %s1225_s8  ;;  %s629_s11 = sshll.u32 %s210_s9, 3 }
  0x1f   : > { %s1085_s10 = scalar_select %p55_p11, %s956_s17, %s57_s27  }
  0x20   : > { %s219_s13 = sadd.s32 %s968_s20, %s630_s12  ;;  %p1091_p0 = pnand %p682_p13, %p1058_p3 }
  0x21   : > { %1227 = sst [smem:[#allocation21_spill]] %s1085_s10  ;;  %s631_s24 = sshll.u32 %s219_s13, 3 }
  0x22   : > { %s232_s28 = sand.u32 1, %s976_s22   ;;  %s1229_s1 = sld [smem:[#allocation22_spill]] }
  0x23   : > { %s236_s8 = scalar_lea.vmem [#allocation5], %s629_s11  ;;  %s233_s21 = scalar_lea.sflag [#allocation6], %s232_s28 }
  0x24   : > { %s246_s27 = sshll.u32 %s236_s8, 4  ;;  %p638_p1 = scmp.ge.s32.totalorder %s976_s22, 1  ;;  %s247_s27 = int_to_ptr.vmem [resolvable:$true] %s246_s27 }
  0x25   : > { %p272_p2 = scmp.lt.s32.totalorder %s976_s22, 9  ;;  %s221_s6 = scalar_lea.hbm %s1205_s0, %s631_s24 }
  0x26   : > { %s214_s7 = scalar_lea.vmem [#allocation2], %s629_s11  ;;  %s211_s8 = scalar_lea.sflag [#allocation3], %s210_s9 }
  0x27   : > { %p1103_p3 = pnand %p638_p1, %p272_p2  ;;  %s257_s10 = scalar_lea.vmem [#allocation7], %s629_s11 }
  0x28   : > { %s242_s26 = scalar_lea.hbm %s1229_s1, %s631_s24  ;;  %s225_s1 = sshll.u32 %s214_s7, 4  ;;  %s226_s1 = int_to_ptr.vmem [resolvable:$true] %s225_s1 }
  0x29   : > { %s244_s25 = sshll.u32 %s242_s26, 4  ;;  %s223_s26 = sshll.u32 %s221_s6, 4  ;;  %s245_s25 = int_to_ptr.hbm [resolvable:$true] %s244_s25  ;;  %s224_s26 = int_to_ptr.hbm [resolvable:$true] %s223_s26 }
  0x2a   : > { %671 = dma.hbm_to_vmem [thread:$0]  (!%p1091_p0), %s245_s25, 128, %s247_s27, %s233_s21  }
  0x2b   : > { %668 = dma.hbm_to_vmem [thread:$0]  (!%p1091_p0), %s224_s26, 128, %s226_s1, %s211_s8  }
  0x2c   : > { %s263_s27 = scalar_lea.hbm %s1207_s2, %s631_s24  ;;  %s267_s17 = sshll.u32 %s257_s10, 4  ;;  %s268_s17 = int_to_ptr.vmem [resolvable:$true] %s267_s17 }
  0x2d   : > { %s265_s20 = sshll.u32 %s263_s27, 4  ;;  %276 = sbr.rel (%p1103_p3) target bundleno = 567 (0x237), region = 32  ;;  %s266_s20 = int_to_ptr.hbm [resolvable:$true] %s265_s20 }
  0x2e   : > { %674 = dma.hbm_to_vmem [thread:$0]  (!%p1091_p0), %s266_s20, 128, %s268_s17, %s233_s21  }
  0x2f   : > { %s1120_s12 = sand.u32 (!%p1103_p3), 1, %s952_s16  }
  0x30   : > { %s1123_s1 = sshll.u32 (!%p1103_p3), %s1120_s12, 3  ;;  %s279_s9 = scalar_lea.sflag (!%p1103_p3), [#allocation3], %s1120_s12 }
  0x31   : > { %s282_s24 = scalar_lea.vmem (!%p1103_p3), [#allocation2], %s1123_s1 }
  0x32   : > { %931 = dma.done.wait (%p1068_p8), %s279_s9, 128  }
  0x33   : > { %933 = vsyncadd (%p1068_p8), %s279_s9, 4294967168  ;;  %s288_s17 = sand.u32 1, %s1044_s23   ;;  %s292_s21 = scalar_lea.vmem [#allocation5], %s1123_s1 }
  0x34   : > { %s289_s20 = scalar_lea.sflag [#allocation6], %s288_s17 }
  0x35   : > { %935 = dma.done.wait (%p1068_p8), %s289_s20, 256  }
  0x36   : > { %937 = vsyncadd (%p1068_p8), %s289_s20, 4294967040  ;;  %vm347_vm0 = vcmask 261120   ;;  %v344_v0 = vld [vmem:[%s292_s21] sm:$0xff]  ;;  %v343_v1 = vld [vmem:[%s282_s24] sm:$0xff]  ;;  %vm374_vm1 = vcmask 64512   ;;  %s302_s23 = scalar_lea.vmem [#allocation7], %s1123_s1 }
  0x37   : > { %644 = vmatpush.xpose.msk.msra.mxu0 %vm347_vm0, %v344_v0  ;;  %v346_v2 = vmul.f32 0.17677669, %v343_v1  ;;  %v345_v10 = vld [vmem:[%s302_s23] sm:$0xff]  ;;  %s649_s30 = sshll.u32 %s964_s19, 2  ;;  %s342_s6 = scalar_lea.vmem [#allocation9], %s1123_s1 }
  0x38   : > { %405 = vmatpush.msra.mxu1 %v345_v10  ;;  %s428_s10 = sadd.s32 %s960_s18, %s649_s30  ;;  %s449_s26 = sshll.u32 %s342_s6, 4  ;;  %s450_s26 = int_to_ptr.vmem [resolvable:$true] %s449_s26 }
  0x39   : > { %s650_s11 = sshll.u32 %s428_s10, 3  ;;  %s417_s8 = scalar_lea.sflag [#allocation10], %s1120_s12 }
  0x3a   : > { %645 = vmatmul.msk.f32.vlgmr.msra.gmra.mxu0 %vm347_vm0, %v346_v2  ;;  %s447_s13 = scalar_lea.hbm %s1209_s4, %s650_s11  ;;  %s862_s27 = scalar_lea.hbm %s1209_s4, 64 }
  0x3b   : > { %s451_s7 = sshll.u32 %s447_s13, 4  ;;  %s452_s7 = int_to_ptr.hbm [resolvable:$true] %s451_s7 }
  0x3c   : > { %s856_s19 = sshra.s32 %s452_s7, 4  ;;  %s857_s19 = int_to_ptr.hbm [resolvable:$true] %s856_s19 }
  0x3d   : > { %s858_s18 = scalar_lea.hbm %s857_s19, 8  ;;  %p863_p7 = scmp.lt.s32.totalorder %s857_s19, %s1209_s4 }
  0x3e   : > { %p859_p4 = scmp.ne.s32.totalorder %s857_s19, %s858_s18  ;;  %p864_p8 = scmp.lt.s32.totalorder %s862_s27, %s858_s18 }
  0x40   : > { %p860_p5 = pnand %p859_p4, %p1072_p9  ;;  %p865_p10 = por %p864_p8, %p863_p7 }
  0x42   : > { %p861_p6 = pneg %p860_p5 }
  0x44   : > { %p866_p11 = pnand %p865_p10, %p861_p6 }
  0xb7   : > { %v371_v3 = vpop.f32.mrf.mxu0 }
  0xb8   : > { %v375_v4 = vsel %vm374_vm1, %v371_v3, -inf }
  0xb9   : > { %376 = vmax.xlane.f32.xlu0 %v375_v4 }
 0x12c   : > { %v377_v5 = vpop.xlane.xlu0 %376 }
 0x12d   : > { %v378_v6 = vsub.f32 %v371_v3, %v377_v5 }
 0x12f   : > { %v379_v7 = vmul.f32 1.442695, %v378_v6 }
 0x131   : > { %748 = vpow2.f32 %v379_v7 }
 0x137   : > { %v749_v8 = vpop.eup %748 }
 0x138   : > { %v381_v9 = vsel %vm374_vm1, %v749_v8, 0.0 }
 0x139   : > { %382 = vadd.xlane.f32.xlu0 %v381_v9 }
 0x1ac   : > { %v383_v11 = vpop.xlane.xlu0 %382 }
 0x1ad   : > { %750 = vrcp.f32 %v383_v11 }
 0x1b3   : > { %v751_v12 = vpop.eup %750 }
 0x1b4   : > { %v385_v13 = vmul.f32 %v751_v12, %v749_v8 }
 0x1b6   : > { %646 = vmatmul.msk.f32.vlgmr.msra.gmra.mxu1 %vm374_vm1, %v385_v13  ;;  %386 = vst.msk [vmem:[%s342_s6] sm:$0xff] %vm374_vm1, %v385_v13 }
 0x1b7   : > { %869 = shalt.err (!%p866_p11)
}
 0x1b8   : > { %662 = dma.vmem_to_hbm [thread:$0]  (%p1072_p9), %s450_s26, 128, %s452_s7, %s417_s8  }
 0x1b9   : > { %s430_s21 = scalar_lea.hbm %s1208_s3, %s650_s11  ;;  %s335_s23 = scalar_lea.vmem [#allocation8], %s1123_s1 }
 0x1ba   : > { %s432_s30 = sshll.u32 %s335_s23, 4  ;;  %s434_s10 = sshll.u32 %s430_s21, 4  ;;  %s433_s30 = int_to_ptr.vmem [resolvable:$true] %s432_s30  ;;  %s435_s10 = int_to_ptr.hbm [resolvable:$true] %s434_s10 }
 0x1bb   : > { %s412_s14 = scalar_lea.sflag [#allocation4], %s1120_s12  ;;  %s884_s29 = sshra.s32 %s435_s10, 4  ;;  %s885_s29 = int_to_ptr.hbm [resolvable:$true] %s884_s29 }
 0x1bc   : > { %s886_s13 = scalar_lea.hbm %s885_s29, 8  ;;  %s890_s11 = scalar_lea.hbm %s1208_s3, 64 }
 0x1bd   : > { %p887_p13 = scmp.ne.s32.totalorder %s885_s29, %s886_s13  ;;  %p891_p2 = scmp.lt.s32.totalorder %s885_s29, %s1208_s3 }
 0x1be   : > { %p892_p3 = scmp.lt.s32.totalorder %s890_s11, %s886_s13 }
 0x1bf   : > { %p888_p0 = pnand %p887_p13, %p1072_p9 }
 0x1c0   : > { %p893_p4 = por %p892_p3, %p891_p2 }
 0x1c1   : > { %p889_p1 = pneg %p888_p0 }
 0x1c3   : > { %p894_p5 = pnand %p893_p4, %p889_p1 }
 0x233   : > { %v407_v14 = vpop.f32.mrf.mxu1 }
 0x234   : > { %410 = vst.msk [vmem:[%s335_s23] sm:$0xff] %vm347_vm0, %v407_v14 }
 0x235   : > { %897 = shalt.err (!%p894_p5)
}
 0x236   : > { %661 = dma.vmem_to_hbm [thread:$0]  (%p1072_p9), %s433_s30, 128, %s435_s10, %s412_s14  }
 0x237 PF: > { %p683_p6 = scmp.ge.s32.totalorder %s976_s22, 2  ;;  %s463_s8 = sand.u32 1, %s948_s15  }
 0x238   : > { %s464_s19 = scalar_lea.sflag [#allocation4], %s463_s8 }
 0x239   : > { %p676_p7 = pnand %p683_p6, %p1078_p12 }
 0x23b   : > { %p677_p8 = pneg %p676_p7 }
 0x23d   : > { %939 = dma.done.wait (%p677_p8), %s464_s19, 128  }
 0x23e   : > { %941 = vsyncadd (%p677_p8), %s464_s19, 4294967168  ;;  %s474_s18 = scalar_lea.sflag [#allocation10], %s463_s8 }
 0x23f   : > { %943 = dma.done.wait (%p677_p8), %s474_s18, 128  }
 0x240   : > { %945 = vsyncadd (%p677_p8), %s474_s18, 4294967168  ;;  %s27_s22 = sadd.s32 1, %s976_s22   ;;  %s1232_s5 = sld [smem:[#allocation15_spill]] }
 0x241   : > { %p24_p10 = scmp.ge.s32.totalorder %s27_s22, 10   ;;  %s1233_s17 = sld [smem:[#allocation21_spill]] }
 0x242   : > { %s1234_s18 = sld [smem:[#allocation16_spill]]  ;;  %s1238_s15 = smov %s952_s16 }
 0x243   : > { %s1235_s19 = sld [smem:[#allocation17_spill]]  ;;  %26 = sbr.rel (!%p24_p10) target bundleno = 13 (0xd), region = 118 }
 0x244   : > { %s1236_s20 = sld [smem:[#allocation18_spill]] }
 0x245   : > { %s1237_s21 = sld [smem:[#allocation19_spill]] }
 0x246   : > { %s1239_s16 = smov %s1232_s5 }
 0x248   :  { %480 = vsyncpa [#allocation3], 1 }
 0x249   :  { %482 = vsyncpa [#allocation3 + $0x1], 1 }
 0x24a   :  { %483 = vsyncpa [#allocation6], 1 }
 0x24b   :  { %485 = vsyncpa [#allocation6 + $0x1], 1 }
 0x24c   :  { %486 = vsyncpa [#allocation4], 1 }
 0x24d   :  { %488 = vsyncpa [#allocation4 + $0x1], 1 }
 0x24e   :  { %489 = vsyncpa [#allocation10], 1 }
 0x24f   :  { %491 = vsyncpa [#allocation10 + $0x1], 1 }

</bundles_post_ra>
